<compile_context>
chip_gen: v7x
topology: tpu7x:2x2x1
jax: 0.10.0
libtpu: 0.0.40
codegen_flags: <defaults>
</compile_context>

<pallas_src>
import jax
import jax.numpy as jnp
from jax.experimental import pallas as pl
from jax.experimental.pallas import tpu as pltpu

D_INPUT = 8
D_SHARED = 12
D_EXPERT = 23
BATCH = 4
_PARAM_ROWS = D_INPUT + 1   # rows 0..7 = W_eff, row 8 = b_eff
_MAX_TM = 512               # row-tile cap for large stacked batches


def fused_affine_kernel(x_ref, p_ref, o_ref):
    """o = x @ W_eff + b_eff for one row-tile.

    p_ref packs [W_eff (8,8); b_eff (1,8)] so all parameters arrive in one DMA
    and stay VMEM-resident across the whole grid (constant index_map).
    One MXU matmul + one VPU bias add per tile.
    """
    w = p_ref[:D_INPUT, :]       # (8, 8)
    b = p_ref[D_INPUT:, :]       # (1, 8), broadcast over rows
    o_ref[...] = (
        jnp.dot(x_ref[...], w, preferred_element_type=jnp.float32) + b
    ).astype(o_ref.dtype)


def fold_params(params):
    """Host-side, ONCE per parameter set (not per forward call).

    params: list of (W, b) in torch convention, W shape (out, in), b shape (out,).
    Returns a single (9, 8) f32 slab: rows 0..7 = W_eff (in, out layout),
    row 8 = b_eff.  Exact because the chain has no activations.
    """
    w_eff = None
    b_eff = None
    for w, b in params:
        wt = jnp.asarray(w, jnp.float32).T               # (in, out)
        bb = jnp.asarray(b, jnp.float32).reshape(1, -1)  # (1, out)
        if w_eff is None:
            w_eff, b_eff = wt, bb
        else:
            w_eff = w_eff @ wt
            b_eff = b_eff @ wt + bb
    return jnp.concatenate([w_eff, b_eff], axis=0)


@jax.jit
def moe_forward(x, packed_params):
    """x: (N, 8) float32 (N may be any stacked batch), packed_params: (9, 8)."""
    n = x.shape[0]
    # Single full-array block when small (block == full dim, always legal);
    # otherwise 512-row tiles (multiple of the 8-sublane granule).
    tm = n if n <= _MAX_TM else _MAX_TM
    grid = (pl.cdiv(n, tm),)
    return pl.pallas_call(
        fused_affine_kernel,
        out_shape=jax.ShapeDtypeStruct((n, D_INPUT), x.dtype),
        grid=grid,
        in_specs=[
            pl.BlockSpec((tm, D_INPUT), lambda i: (i, 0)),
            # params: same block for every grid point -> loaded once, resident
            pl.BlockSpec((_PARAM_ROWS, D_INPUT), lambda i: (0, 0)),
        ],
        out_specs=pl.BlockSpec((tm, D_INPUT), lambda i: (i, 0)),
        compiler_params=pltpu.CompilerParams(
            dimension_semantics=("parallel",)),
    )(x, packed_params)


def _init_linear(key, in_features, out_features):
    """Deterministic synthetic init mimicking torch.nn.Linear's uniform(-k, k),
    k = 1/sqrt(in_features). (Synthetic weights, not a checkpoint load.)"""
    kw, kb = jax.random.split(key)
    bound = 1.0 / jnp.sqrt(jnp.float32(in_features))
    w = jax.random.uniform(kw, (out_features, in_features), jnp.float32, -bound, bound)
    b = jax.random.uniform(kb, (out_features,), jnp.float32, -bound, bound)
    return w, b


def _reference_forward(x, params):
    h = x
    for w, b in params:
        h = h @ w.T + b
    return h


if __name__ == "__main__":
    root = jax.random.PRNGKey(0)
    k_x, k_big, k_huge, k1, k2, k3, k4 = jax.random.split(root, 7)

    # Layer shapes exactly as in MixtureOfExperts.__init__:
    params = [
        _init_linear(k1, D_INPUT, D_SHARED),    # nn.Linear(8, 12)
        _init_linear(k2, D_SHARED, D_EXPERT),   # shared: nn.Linear(12, 23)
        _init_linear(k3, D_EXPERT, D_SHARED),   # expert: nn.Linear(23, 12)
        _init_linear(k4, D_SHARED, D_INPUT),    # nn.Linear(12, 8)
    ]

    # Fold + pack ONCE; reused by every forward call.
    packed = jax.block_until_ready(fold_params(params))

    # get_input: torch.rand(4, 8) -> uniform [0, 1)
    x = jax.random.uniform(k_x, (BATCH, D_INPUT), jnp.float32)
    out = jax.block_until_ready(moe_forward(x, packed))
    ref = _reference_forward(x, params)
    assert out.shape == (BATCH, D_INPUT), out.shape
    assert jnp.allclose(out, ref, atol=1e-5, rtol=1e-5), "mismatch vs JAX reference"

    # Batched invocation: 32 stacked (4, 8) microbatches in ONE pallas_call
    # (single grid point, full-array block).
    x_big = jax.random.uniform(k_big, (32 * BATCH, D_INPUT), jnp.float32)
    out_big = jax.block_until_ready(moe_forward(x_big, packed))
    ref_big = _reference_forward(x_big, params)
    assert out_big.shape == (32 * BATCH, D_INPUT), out_big.shape
    assert jnp.allclose(out_big, ref_big, atol=1e-5, rtol=1e-5), "batched mismatch"

    # Large stacked batch exercising the pipelined grid path (ragged last tile).
    x_huge = jax.random.uniform(k_huge, (1030, D_INPUT), jnp.float32)
    out_huge = jax.block_until_ready(moe_forward(x_huge, packed))
    ref_huge = _reference_forward(x_huge, params)
    assert out_huge.shape == (1030, D_INPUT), out_huge.shape
    assert jnp.allclose(out_huge, ref_huge, atol=1e-5, rtol=1e-5), "grid-path mismatch"

    print("KERNEL_OK")
</pallas_src>

<mosaic_0001>
module attributes {stable_mosaic.version = 11 : i64} {
  func.func @fused_affine_kernel(%arg0: i32, %arg1: memref<4x8xf32, #tpu.memory_space<vmem>>, %arg2: memref<9x8xf32, #tpu.memory_space<vmem>>, %arg3: memref<4x8xf32, #tpu.memory_space<vmem>>) attributes {dimension_semantics = [#tpu.dimension_semantics<parallel>], iteration_bounds = array<i64: 1>, scalar_prefetch = 0 : i64, scratch_operands = 0 : i64, tpu.core_type = #tpu.core_type<tc>, window_params = [{transform_indices = @transform_0, window_bounds = array<i64: 4, 8>}, {pipeline_mode = #tpu.pipeline_mode<synchronous>, transform_indices = @transform_1, window_bounds = array<i64: 9, 8>}, {transform_indices = @transform_2, window_bounds = array<i64: 4, 8>}]} {
    %c0 = arith.constant 0 : index
    %c0_0 = arith.constant 0 : index
    %0 = vector.load %arg2[%c0, %c0_0] : memref<9x8xf32, #tpu.memory_space<vmem>>, vector<8x8xf32>
    %c8 = arith.constant 8 : index
    %c0_1 = arith.constant 0 : index
    %1 = vector.load %arg2[%c8, %c0_1] : memref<9x8xf32, #tpu.memory_space<vmem>>, vector<1x8xf32>
    %c0_2 = arith.constant 0 : index
    %c0_3 = arith.constant 0 : index
    %2 = vector.load %arg1[%c0_2, %c0_3] : memref<4x8xf32, #tpu.memory_space<vmem>>, vector<4x8xf32>
    %cst = arith.constant dense<0.000000e+00> : vector<4x8xf32>
    %3 = tpu.matmul %2, %0, %cst {dimension_numbers = #tpu.dot_dimension_numbers<[1], [0], [0], [1], [0, 0, 1, 1], [], []>} : vector<4x8xf32>, vector<8x8xf32>, vector<4x8xf32> -> vector<4x8xf32>
    %4 = vector.broadcast %1 : vector<1x8xf32> to vector<4x8xf32>
    %5 = arith.addf %3, %4 : vector<4x8xf32>
    %c0_4 = arith.constant 0 : index
    %c0_5 = arith.constant 0 : index
    %6 = vector.load %arg3[%c0_4, %c0_5] : memref<4x8xf32, #tpu.memory_space<vmem>>, vector<4x8xf32>
    tpu.vector_store %arg3[%c0_4, %c0_5], %5 {strides = array<i32>} : memref<4x8xf32, #tpu.memory_space<vmem>>, vector<4x8xf32>,
    return
  }
  func.func @transform_0(%arg0: i32) -> (i32, i32) {
    %c0_i32 = arith.constant 0 : i32
    %c0_i32_0 = arith.constant 0 : i32
    return %arg0, %c0_i32 : i32, i32
  }
  func.func @transform_1(%arg0: i32) -> (i32, i32) {
    %c0_i32 = arith.constant 0 : i32
    %c0_i32_0 = arith.constant 0 : i32
    %c0_i32_1 = arith.constant 0 : i32
    return %c0_i32, %c0_i32_0 : i32, i32
  }
  func.func @transform_2(%arg0: i32) -> (i32, i32) {
    %c0_i32 = arith.constant 0 : i32
    %c0_i32_0 = arith.constant 0 : i32
    return %arg0, %c0_i32 : i32, i32
  }
}

</mosaic_0001>

<bundles_post_ra>
// kernel: moe_forward.1
= control target key start
LH: loop header
LB: loop body
LE: loop exit
PB: predicated region body
PF: predicated region fallthrough
CT: control target
= control target key end

     0   :  { %vm19_vm0 = vcmask 64512   ;;  %v145_v2 = vmov 0.0   ;;  %vm146_vm1 = vmmov 0   ;;  %s184_s0 = inlined_call_operand.vmem [shape: f32[4,8], index: 0, kind: input, shape index: {}]   ;;  %s185_s1 = inlined_call_operand.vmem [shape: f32[9,8], index: 1, kind: input, shape index: {}]   ;;  %s186_s2 = inlined_call_operand.hbm [shape: f32[4,8], index: 2, kind: output, shape index: {}]  }
   0x1   :  { %v12_v0 = vld [vmem:[%s185_s1] sm:$0xff]  ;;  %113 = vmatprep.subr.mxu0 %v145_v2  ;;  %115 = vmatprep.mubr.msk.f32.mxu0 %vm146_vm1, %v145_v2 }
   0x2   :  { %v14_v1 = vld [vmem:[%s184_s0] sm:$0xf] }
   0x3   :  { %7 = vsyncpa [#allocation3], 0  ;;  %114 = vmatpush3.msra.mxu0 %v12_v0  ;;  %v109_v3 = vld [vmem:[%s185_s1 + $0x8] ss:$0 sm:$0xff]  ;;  %s147_s15 = smov [#allocation2]   ;;  %vm93_vm2 = vcmask 60416  }
   0x4   :  { %116 = vmatmul.mubr.msk.f32.vlgmr.msra.gmra.mrb[0].mxu0 %vm19_vm0, %v14_v1  ;;  %s101_s16 = sshll.u32 %s147_s15, 4  ;;  %s102_s16 = int_to_ptr.vmem [resolvable:$true] %s101_s16 }
   0x5   :  { %s121_s0 = scalar_lea.vmem %s102_s16, 64  ;;  %p126_p1 = scmp.lt.s32.totalorder %s102_s16, %s102_s16 }
   0x6   :  { %p122_p0 = scmp.ne.s32.totalorder %s102_s16, %s121_s0  ;;  %p127_p2 = scmp.lt.s32.totalorder %s121_s0, %s121_s0 }
   0x8   :  { %p128_p3 = por %p127_p2, %p126_p1 }
   0xa   :  { %p129_p4 = pnand %p128_p3, %p122_p0 }
  0xd7   :  { %v89_v4 = vpop.f32.mrb[0].mxu0 }
  0xd8   :  { %v90_v5 = vadd.f32 %v109_v3, %v89_v4  ;;  %v117_v6 = vpop.f32.mrb[1].mxu0 }
  0xda   :  { %94 = vst.msk [vmem:[#allocation2] sm:$0xf] %vm93_vm2, %v90_v5 }
  0xdb   :  { %132 = shalt.err (!%p129_p4)
}
  0xdc   :  { %s133_s19 = scalar_lea.hbm %s186_s2, 64 }
  0xdd   :  { %p134_p5 = scmp.ne.s32.totalorder %s186_s2, %s133_s19  ;;  %p137_p6 = scmp.lt.u32.totalorder %s133_s19, %s186_s2 }
  0xdf   :  { %p139_p7 = pnand %p137_p6, %p134_p5 }
  0xe1   :  { %142 = shalt.err (!%p139_p7)
}
  0xe2   :  { %104 = dma.vmem_to_hbm [thread:$0]  %s102_s16, 64, %s186_s2, [#allocation3]  }
  0xe3   :  { %143 = dma.done.wait [#allocation3], 64  }
  0xe4   :  { %144 = vsyncadd [#allocation3], 4294967232 }
  0xe5   :  { %108 = vsyncpa [#allocation3], 1 }

</bundles_post_ra>
